<compile_context>
chip_gen: v7x
topology: tpu7x:2x2x1
jax: 0.10.0
libtpu: 0.0.40
codegen_flags: <defaults>
</compile_context>

<pallas_src>
import jax
import jax.numpy as jnp
from jax.experimental import pallas as pl
from jax.experimental.pallas import tpu as pltpu


def _subject_kernel(x_ref, w_ref, b_ref, heads_ref, tails_ref):
    # x_ref:     (TM, H) activation rows for this grid step (any float dtype)
    # w_ref:     (2, H)  fused [heads; tails] weight rows, lane-major in H
    # b_ref:     (2,)    fused biases in SMEM
    # heads_ref: (1, TM) lane-dense output slab
    # tails_ref: (1, TM) lane-dense output slab
    x = x_ref[...].astype(jnp.float32)                       # (TM, H)

    # Both heads in one pass over x: VPU broadcast-multiply + reduce over the
    # lane (H) axis; keepdims keeps everything rank-2.
    h = jnp.sum(x * w_ref[0:1, :], axis=-1, keepdims=True)   # (TM, 1)
    t = jnp.sum(x * w_ref[1:2, :], axis=-1, keepdims=True)   # (TM, 1)

    # Bias + sigmoid (EUP), then relayout the tiny (TM, 1) column into a
    # lane-dense (1, TM) row for unmasked stores.  This relayout moves only
    # 2*TM values per TM*H-element tile (<1% of the HBM traffic).
    heads_ref[...] = jax.nn.sigmoid(h + b_ref[0]).reshape(1, -1)
    tails_ref[...] = jax.nn.sigmoid(t + b_ref[1]).reshape(1, -1)


def _pick_row_tile(n_rows, feat, itemsize, tile_budget_bytes=12 << 20):
    """Largest row tile whose double-buffered input tile fits a conservative
    VMEM budget.  Sized to run under default scoped-VMEM limits on v5e/v6e
    (128 MiB physical) AND v7x (64 MiB physical).  On v5e/v6e you can raise
    `tile_budget_bytes` plus CompilerParams(vmem_limit_bytes=...) for even
    bigger DMAs; do NOT blindly reuse such a tile on v7x.
    """
    cap = tile_budget_bytes // (2 * feat * itemsize)      # 2 pipeline buffers
    cap = max(128, (cap // 128) * 128)                    # lane-aligned
    cap = min(cap, 2048)
    return n_rows if n_rows <= cap else cap


@jax.jit
def subject_model_forward(bert_outputs, w_heads, b_heads, w_tails, b_tails):
    """bert_outputs: (B, S, H) float (f32 or bf16).
    Returns (sub_heads, sub_tails), each (B, S) float32."""
    B, S, H = bert_outputs.shape
    N = B * S
    x = bert_outputs.reshape(N, H)

    # Fuse both heads: lane-major (2, H) weights + (2,) biases (SMEM).
    w = jnp.concatenate(
        [jnp.asarray(w_heads, jnp.float32).reshape(1, H),
         jnp.asarray(w_tails, jnp.float32).reshape(1, H)], axis=0)        # (2, H)
    b = jnp.stack([jnp.asarray(b_heads, jnp.float32).reshape(()),
                   jnp.asarray(b_tails, jnp.float32).reshape(())])        # (2,)

    tm = _pick_row_tile(N, H, jnp.dtype(bert_outputs.dtype).itemsize)
    grid = (pl.cdiv(N, tm),)

    grid_spec = pltpu.PrefetchScalarGridSpec(
        num_scalar_prefetch=0,
        grid=grid,
        in_specs=[
            pl.BlockSpec((tm, H), lambda i: (i, 0)),             # activation rows
            pl.BlockSpec((2, H), lambda i: (0, 0)),              # resident fused weights
            pl.BlockSpec(memory_space=pltpu.MemorySpace.SMEM),   # fused biases
        ],
        out_specs=[
            pl.BlockSpec((1, tm), lambda i: (0, i)),             # heads (lane-dense)
            pl.BlockSpec((1, tm), lambda i: (0, i)),             # tails (lane-dense)
        ],
    )

    heads, tails = pl.pallas_call(
        _subject_kernel,
        grid_spec=grid_spec,
        out_shape=(
            jax.ShapeDtypeStruct((1, N), jnp.float32),
            jax.ShapeDtypeStruct((1, N), jnp.float32),
        ),
        compiler_params=pltpu.CompilerParams(
            # Row-tile axis is embarrassingly parallel -> megacore sharding on v7x.
            dimension_semantics=("parallel",)),
    )(x, w, b)

    return heads.reshape(B, S), tails.reshape(B, S)


if __name__ == "__main__":
    # Small synthetic config: bert_feature_size = 32, batch = 2, seq = 8.
    B, S, H = 2, 8, 32

    key = jax.random.PRNGKey(0)
    k_x, k_wh, k_bh, k_wt, k_bt = jax.random.split(key, 5)

    bert_outputs = jax.random.normal(k_x, (B, S, H), dtype=jnp.float32)
    # Deterministic "Linear" parameters (synthetic, not a checkpoint load)
    w_heads = jax.random.normal(k_wh, (H,), dtype=jnp.float32) * 0.1
    b_heads = jax.random.normal(k_bh, (), dtype=jnp.float32) * 0.1
    w_tails = jax.random.normal(k_wt, (H,), dtype=jnp.float32) * 0.1
    b_tails = jax.random.normal(k_bt, (), dtype=jnp.float32) * 0.1

    sub_heads, sub_tails = subject_model_forward(
        bert_outputs, w_heads, b_heads, w_tails, b_tails)
    jax.block_until_ready((sub_heads, sub_tails))

    # Pure-JAX reference check
    ref_heads = jax.nn.sigmoid(bert_outputs @ w_heads + b_heads)
    ref_tails = jax.nn.sigmoid(bert_outputs @ w_tails + b_tails)
    assert sub_heads.shape == (B, S) and sub_tails.shape == (B, S)
    assert jnp.allclose(sub_heads, ref_heads, atol=1e-5)
    assert jnp.allclose(sub_tails, ref_tails, atol=1e-5)

    print("KERNEL_OK")
</pallas_src>

<mosaic_0001>
module attributes {stable_mosaic.version = 11 : i64} {
  func.func @_subject_kernel(%arg0: i32, %arg1: memref<16x32xf32, #tpu.memory_space<vmem>>, %arg2: memref<2x32xf32, #tpu.memory_space<vmem>>, %arg3: memref<2xf32, #tpu.memory_space<smem>>, %arg4: memref<1x16xf32, #tpu.memory_space<vmem>>, %arg5: memref<1x16xf32, #tpu.memory_space<vmem>>) attributes {dimension_semantics = [#tpu.dimension_semantics<parallel>], iteration_bounds = array<i64: 1>, scalar_prefetch = 0 : i64, scratch_operands = 0 : i64, tpu.core_type = #tpu.core_type<tc>, window_params = [{transform_indices = @transform_0, window_bounds = array<i64: 16, 32>}, {pipeline_mode = #tpu.pipeline_mode<synchronous>, transform_indices = @transform_1, window_bounds = array<i64: 2, 32>}, {transform_indices = @transform_2, window_bounds = array<i64: 2>}, {transform_indices = @transform_3, window_bounds = array<i64: 1, 16>}, {transform_indices = @transform_4, window_bounds = array<i64: 1, 16>}]} {
    %c0 = arith.constant 0 : index
    %c0_0 = arith.constant 0 : index
    %0 = vector.load %arg1[%c0, %c0_0] : memref<16x32xf32, #tpu.memory_space<vmem>>, vector<16x32xf32>
    %c0_1 = arith.constant 0 : index
    %c0_2 = arith.constant 0 : index
    %1 = vector.load %arg2[%c0_1, %c0_2] : memref<2x32xf32, #tpu.memory_space<vmem>>, vector<1x32xf32>
    %2 = vector.broadcast %1 : vector<1x32xf32> to vector<16x32xf32>
    %3 = arith.mulf %0, %2 : vector<16x32xf32>
    %cst = arith.constant dense<0.000000e+00> : vector<16xf32>
    %4 = vector.multi_reduction <add>, %3, %cst [1] : vector<16x32xf32> to vector<16xf32>
    %5 = vector.shape_cast %4 : vector<16xf32> to vector<16x1xf32>
    %c1 = arith.constant 1 : index
    %c0_3 = arith.constant 0 : index
    %6 = vector.load %arg2[%c1, %c0_3] : memref<2x32xf32, #tpu.memory_space<vmem>>, vector<1x32xf32>
    %7 = vector.broadcast %6 : vector<1x32xf32> to vector<16x32xf32>
    %8 = arith.mulf %0, %7 : vector<16x32xf32>
    %cst_4 = arith.constant dense<0.000000e+00> : vector<16xf32>
    %9 = vector.multi_reduction <add>, %8, %cst_4 [1] : vector<16x32xf32> to vector<16xf32>
    %10 = vector.shape_cast %9 : vector<16xf32> to vector<16x1xf32>
    %c0_5 = arith.constant 0 : index
    %11 = memref.load %arg3[%c0_5] : memref<2xf32, #tpu.memory_space<smem>>
    %12 = vector.broadcast %11 : f32 to vector<16x1xf32>
    %13 = arith.addf %5, %12 : vector<16x1xf32>
    %14 = arith.negf %13 : vector<16x1xf32>
    %15 = math.exp %14 : vector<16x1xf32>
    %cst_6 = arith.constant 1.000000e+00 : f32
    %16 = vector.broadcast %cst_6 : f32 to vector<16x1xf32>
    %17 = arith.addf %16, %15 : vector<16x1xf32>
    %18 = arith.divf %16, %17 : vector<16x1xf32>
    %19 = vector.shape_cast %18 : vector<16x1xf32> to vector<1x16xf32>
    %c0_7 = arith.constant 0 : index
    %c0_8 = arith.constant 0 : index
    %20 = vector.load %arg4[%c0_7, %c0_8] : memref<1x16xf32, #tpu.memory_space<vmem>>, vector<1x16xf32>
    tpu.vector_store %arg4[%c0_7, %c0_8], %19 {strides = array<i32>} : memref<1x16xf32, #tpu.memory_space<vmem>>, vector<1x16xf32>,
    %c1_9 = arith.constant 1 : index
    %21 = memref.load %arg3[%c1_9] : memref<2xf32, #tpu.memory_space<smem>>
    %22 = vector.broadcast %21 : f32 to vector<16x1xf32>
    %23 = arith.addf %10, %22 : vector<16x1xf32>
    %24 = arith.negf %23 : vector<16x1xf32>
    %25 = math.exp %24 : vector<16x1xf32>
    %cst_10 = arith.constant 1.000000e+00 : f32
    %26 = vector.broadcast %cst_10 : f32 to vector<16x1xf32>
    %27 = arith.addf %26, %25 : vector<16x1xf32>
    %28 = arith.divf %26, %27 : vector<16x1xf32>
    %29 = vector.shape_cast %28 : vector<16x1xf32> to vector<1x16xf32>
    %c0_11 = arith.constant 0 : index
    %c0_12 = arith.constant 0 : index
    %30 = vector.load %arg5[%c0_11, %c0_12] : memref<1x16xf32, #tpu.memory_space<vmem>>, vector<1x16xf32>
    tpu.vector_store %arg5[%c0_11, %c0_12], %29 {strides = array<i32>} : memref<1x16xf32, #tpu.memory_space<vmem>>, vector<1x16xf32>,
    return
  }
  func.func @transform_0(%arg0: i32) -> (i32, i32) {
    %c0_i32 = arith.constant 0 : i32
    %c0_i32_0 = arith.constant 0 : i32
    return %arg0, %c0_i32 : i32, i32
  }
  func.func @transform_1(%arg0: i32) -> (i32, i32) {
    %c0_i32 = arith.constant 0 : i32
    %c0_i32_0 = arith.constant 0 : i32
    %c0_i32_1 = arith.constant 0 : i32
    return %c0_i32, %c0_i32_0 : i32, i32
  }
  func.func @transform_2(%arg0: i32) -> i32 {
    %c0_i32 = arith.constant 0 : i32
    %c0_i32_0 = arith.constant 0 : i32
    return %c0_i32 : i32
  }
  func.func @transform_3(%arg0: i32) -> (i32, i32) {
    %c0_i32 = arith.constant 0 : i32
    %c0_i32_0 = arith.constant 0 : i32
    return %c0_i32, %arg0 : i32, i32
  }
  func.func @transform_4(%arg0: i32) -> (i32, i32) {
    %c0_i32 = arith.constant 0 : i32
    %c0_i32_0 = arith.constant 0 : i32
    return %c0_i32, %arg0 : i32, i32
  }
}

</mosaic_0001>

<bundles_post_ra>
// kernel: subject_model_forward.1
= control target key start
LH: loop header
LB: loop body
LE: loop exit
PB: predicated region body
PF: predicated region fallthrough
CT: control target
= control target key end

     0   :  { %10 = vsyncpa [#allocation3], 0  ;;  %s215_s0 = inlined_call_operand.vmem [shape: f32[16,32], index: 0, kind: input, shape index: {}]   ;;  %s216_s1 = inlined_call_operand.vmem [shape: f32[2,32], index: 1, kind: input, shape index: {}]   ;;  %s217_s2 = inlined_call_operand.vmem [shape: f32[2], index: 2, kind: input, shape index: {}]   ;;  %s218_s3 = inlined_call_operand.vmem [shape: f32[1,16], index: 3, kind: output, shape index: {0}]   ;;  %s219_s4 = inlined_call_operand.vmem [shape: f32[1,16], index: 4, kind: output, shape index: {1}]  }
   0x1   :  { %s21_s17 = sshll.u32 %s217_s2, 4  ;;  %s22_s17 = int_to_ptr.vmem [resolvable:$true] %s21_s17 }
   0x2   :  { %s154_s18 = scalar_lea.vmem %s22_s17, 16  ;;  %p159_p1 = scmp.lt.s32.totalorder %s22_s17, %s22_s17 }
   0x3   :  { %p155_p0 = scmp.ne.s32.totalorder %s22_s17, %s154_s18  ;;  %p160_p2 = scmp.lt.s32.totalorder %s154_s18, %s154_s18 }
   0x5   :  { %p161_p3 = por %p160_p2, %p159_p1 }
   0x7   :  { %p162_p4 = pnand %p161_p3, %p155_p0 }
   0x9   :  { %165 = shalt.err (!%p162_p4)
}
   0xa   :  { %s168_s19 = smov [#allocation2]  }
   0xb   :  { %24 = dma.vmem_to_smem %s22_s17, 16, %s168_s19, [#allocation3]  }
   0xc   :  { %166 = dma.done.wait [#allocation3], 16  }
   0xd   :  { %167 = vsyncadd [#allocation3], 4294967280 }
   0xe   :  { %28 = sfence }
   0xf   :  { %v29_v0 = vld [vmem:[%s215_s0] sm:$0xff]  ;;  %vm38_vm0 = vcmask 261120   ;;  %v30_v5 = vld [vmem:[%s215_s0 + $0x8] sm:$0xff]  ;;  %s134_s27 = sld [smem:[#allocation2 + $0x1]]  ;;  %s58_s28 = sld [smem:[#allocation2]]  ;;  %v76_v31 = vlaneseq  ;;  %vm87_vm1 = vcmask 130112  }
  0x10   :  { %v131_v1 = vld [vmem:[%s216_s1 + $0x1] ss:$0 sm:$0xff]  ;;  %v130_v2 = vld [vmem:[%s216_s1] ss:$0 sm:$0xff]  ;;  %vm90_vm2 = vcmask 122880  }
  0x11   :  { %v50_v3 = vmul.f32 %v131_v1, %v29_v0  ;;  %v36_v4 = vmul.f32 %v130_v2, %v29_v0  ;;  %v51_v6 = vmul.f32 %v131_v1, %v30_v5  ;;  %v37_v7 = vmul.f32 %v130_v2, %v30_v5 }
  0x12   :  { %v77_v35 = vand.u32 127, %v76_v31  ;;  %v79_v36 = vshrl.u32 %v76_v31, 7 }
  0x13   :  { %v52_v8 = vsel %vm38_vm0, %v50_v3, 0.0  ;;  %v39_v9 = vsel %vm38_vm0, %v36_v4, 0.0  ;;  %v55_v10 = vsel %vm38_vm0, %v51_v6, 0.0  ;;  %v42_v11 = vsel %vm38_vm0, %v37_v7, 0.0 }
  0x14   :  { %53 = vadd.xlane.f32.xlu1 %v52_v8  ;;  %40 = vadd.xlane.f32.xlu0 %v39_v9  ;;  %v82_v37 = vadd.s32 4294967288, %v77_v35  ;;  %v80_v38 = vsub.s32 %v77_v35, %v79_v36 }
  0x15   :  { %v93_v12 = vstv %s134_s27  ;;  %v59_v13 = vstv %s58_s28 }
  0x16   :  { %v85_v39 = vsub.s32 %v82_v37, %v79_v36 }
  0x18   :  { %56 = vadd.xlane.f32.xlu1 %v55_v10  ;;  %43 = vadd.xlane.f32.xlu0 %v42_v11 }
  0xa1   :  { %v54_v14 = vpop.xlane.xlu1 %53  ;;  %v41_v15 = vpop.xlane.xlu0 %40 }
  0xa2   :  { %v94_v16 = vadd.f32 %v93_v12, %v54_v14  ;;  %v60_v17 = vadd.f32 %v59_v13, %v41_v15 }
  0xa4   :  { %v135_v18 = vmul.f32 -1.442695, %v94_v16  ;;  %v132_v19 = vmul.f32 -1.442695, %v60_v17 }
  0xa5   :  { %v57_v20 = vpop.xlane.xlu1 %56  ;;  %v44_v21 = vpop.xlane.xlu0 %43 }
  0xa6   :  { %138 = vpow2.f32 %v135_v18  ;;  %v95_v22 = vadd.f32 %v93_v12, %v57_v20  ;;  %v61_v23 = vadd.f32 %v59_v13, %v44_v21 }
  0xa7   :  { %140 = vpow2.f32 %v132_v19 }
  0xa8   :  { %v136_v24 = vmul.f32 -1.442695, %v95_v22  ;;  %v133_v25 = vmul.f32 -1.442695, %v61_v23 }
  0xaa   :  { %142 = vpow2.f32 %v136_v24 }
  0xab   :  { %144 = vpow2.f32 %v133_v25 }
  0xb0   :  { %v139_v26 = vpop.eup %138 }
  0xb1   :  { %v141_v27 = vpop.eup %140  ;;  %v102_v28 = vadd.f32 1.0, %v139_v26 }
  0xb2   :  { %v68_v29 = vadd.f32 1.0, %v141_v27 }
  0xb3   :  { %146 = vrcp.f32 %v102_v28 }
  0xb4   :  { %v143_v30 = vpop.eup %142  ;;  %148 = vrcp.f32 %v68_v29 }
  0xb5   :  { %v145_v32 = vpop.eup %144  ;;  %v103_v33 = vadd.f32 1.0, %v143_v30 }
  0xb6   :  { %v69_v34 = vadd.f32 1.0, %v145_v32 }
  0xb7   :  { %150 = vrcp.f32 %v103_v33 }
  0xb8   :  { %152 = vrcp.f32 %v69_v34 }
  0xbd   :  { %v147_v40 = vpop.eup %146 }
  0xbe   :  { %v149_v41 = vpop.eup %148  ;;  %v113_v44 = vrot.slane %v147_v40, %v80_v38 }
  0xbf   :  { %v81_v46 = vrot.slane %v149_v41, %v80_v38 }
  0xc1   :  { %v151_v42 = vpop.eup %150 }
  0xc2   :  { %v153_v43 = vpop.eup %152  ;;  %v117_v45 = vrot.slane %v151_v42, %v85_v39 }
  0xc3   :  { %v86_v47 = vrot.slane %v153_v43, %v85_v39 }
  0xc4   :  { %v118_v48 = vsel %vm87_vm1, %v117_v45, %v113_v44 }
  0xc5   :  { %120 = vst.msk [vmem:[%s219_s4] sm:$0x1] %vm90_vm2, %v118_v48  ;;  %v88_v49 = vsel %vm87_vm1, %v86_v47, %v81_v46 }
  0xc6   :  { %91 = vst.msk [vmem:[%s218_s3] sm:$0x1] %vm90_vm2, %v88_v49 }
  0xc7   :  { %129 = vsyncpa [#allocation3], 1 }

</bundles_post_ra>
